<compile_context>
chip_gen: v5e
topology: v5e:2x2
jax: 0.10.0
libtpu: 0.0.40
codegen_flags: <defaults>
</compile_context>

<pallas_src>
import functools

import jax
import jax.numpy as jnp
from jax.experimental import pallas as pl
from jax.experimental.pallas import tpu as pltpu


# ------------------------------------------------------------------ phase 1 -
def _proj_kernel(h_ref, wext_ref, wh_ref, e12_ref):
    """wh_ext = h @ [W | W@a1 | W@a2]; split into Wh (bf16) and logit cols."""
    whe = jnp.dot(h_ref[...], wext_ref[...],
                  preferred_element_type=jnp.float32)          # (N, Fout+2)
    fout = wh_ref.shape[1]
    wh_ref[...] = whe[:, :fout].astype(wh_ref.dtype)           # (N, Fout) bf16
    e12_ref[...] = whe[:, fout:]                               # (N, 2)    f32


# ------------------------------------------------------------------ phase 2 -
def _attn_kernel(e1_ref, e2_ref, adj_ref, wh_ref, fcw_ref, fcb_ref, out_ref,
                 *, alpha):
    # e1:(TQ,1) f32   e2:(1,N) f32   adj:(TQ,N) i8   wh:(N,Fout) bf16
    # fcw:(Fout,Fin) bf16   fcb:(1,Fin) f32   out:(TQ,Fin) f32
    e = e1_ref[...] + e2_ref[...]                              # (TQ, N)
    e = jnp.where(e > 0, e, alpha * e)                         # LeakyReLU(alpha)
    att = jnp.where(adj_ref[...] > 0, e, jnp.float32(-9.0e15))

    # Row softmax kept in f32; normalization applied after the (cheap) small
    # matmul so the per-lane multiply runs on (TQ, Fout) instead of (TQ, N).
    m = jnp.max(att, axis=1, keepdims=True)
    p = jnp.exp(att - m)                                       # (TQ, N)
    inv = pl.reciprocal(jnp.sum(p, axis=1, keepdims=True), approx=True)

    # TODO(synk): attention dropout is eval-mode identity here.
    hp = jnp.dot(p.astype(jnp.bfloat16), wh_ref[...],
                 preferred_element_type=jnp.float32) * inv     # (TQ, Fout)
    hp = jnp.dot(hp.astype(jnp.bfloat16), fcw_ref[...],
                 preferred_element_type=jnp.float32) + fcb_ref[...]
    out_ref[...] = jnp.where(hp > 0, hp, jnp.expm1(hp))        # ELU (concat=True)


# ------------------------------------------------------------------ wrapper -
def _default_tile_q(n):
    # 128 keeps double-buffering alive within the v7x 64 MiB VMEM budget for
    # large N while still being a multiple of the int8 (32, 128) sublane tile.
    for cand in (128, 256, 512, 64, 32, 16, 8):
        if n % cand == 0:
            return cand
    return n


def graph_attention_layer(h, adj, W, a, fc_w, fc_b, *, alpha=0.2, tile_q=None):
    """Pallas forward of GraphAttentionLayer (concat=True, eval-mode dropout).

    h:    (N, Fin)      node features
    adj:  (N, N)        adjacency (>0 means edge)
    W:    (Fin, Fout)
    a:    (2*Fout, 1)   attention vector
    fc_w: (Fin, Fout)   torch nn.Linear(out_features, in_features).weight
    fc_b: (Fin,)        its bias
    returns (N, Fin) float32
    """
    n, fin = h.shape
    fout = W.shape[1]
    if tile_q is None:
        tile_q = _default_tile_q(n)

    # Fold the two attention matvecs into the projection matmul RHS.
    a1, a2 = a[:fout, :], a[fout:, :]
    w_ext = jnp.concatenate([W, W @ a1, W @ a2], axis=1)       # (Fin, Fout+2)

    vmem = pl.BlockSpec(memory_space=pltpu.MemorySpace.VMEM)
    wh, e12 = pl.pallas_call(
        _proj_kernel,
        out_shape=(jax.ShapeDtypeStruct((n, fout), jnp.bfloat16),
                   jax.ShapeDtypeStruct((n, 2), jnp.float32)),
        in_specs=[vmem, vmem],
        out_specs=(vmem, vmem),
        compiler_params=pltpu.CompilerParams(
            vmem_limit_bytes=64 * 1024 * 1024),
    )(h.astype(jnp.bfloat16), w_ext.astype(jnp.bfloat16))

    e1 = e12[:, 0:1]                       # (N, 1)  per-query logit term
    e2_row = e12[:, 1:2].T                 # (1, N)  per-key term (wrapper-level
    #                                        layout plumbing; no in-kernel transpose)
    adj_i8 = (adj > 0).astype(jnp.int8)    # mask-only use: 4x less HBM/VMEM
    fcw_t = fc_w.T.astype(jnp.bfloat16)    # (Fout, Fin): x @ fc_w.T
    fcb = fc_b.reshape(1, fin).astype(jnp.float32)

    grid = (pl.cdiv(n, tile_q),)
    kernel = functools.partial(_attn_kernel, alpha=float(alpha))
    return pl.pallas_call(
        kernel,
        out_shape=jax.ShapeDtypeStruct((n, fin), jnp.float32),
        grid=grid,
        in_specs=[
            pl.BlockSpec((tile_q, 1), lambda i: (i, 0)),   # e1 : streamed rows
            pl.BlockSpec((1, n), lambda i: (0, 0)),        # e2 : resident
            pl.BlockSpec((tile_q, n), lambda i: (i, 0)),   # adj: streamed rows
            pl.BlockSpec((n, fout), lambda i: (0, 0)),     # Wh : resident (bf16)
            pl.BlockSpec((fout, fin), lambda i: (0, 0)),   # fc.weight^T resident
            pl.BlockSpec((1, fin), lambda i: (0, 0)),      # fc.bias resident
        ],
        out_specs=pl.BlockSpec((tile_q, fin), lambda i: (i, 0)),
        compiler_params=pltpu.CompilerParams(
            dimension_semantics=("parallel",),             # megacore on v7x
            vmem_limit_bytes=64 * 1024 * 1024),
    )(e1, e2_row, adj_i8, wh, fcw_t, fcb)


# --------------------------------------------------------------- references -
def _reference(h, adj, W, a, fc_w, fc_b, alpha=0.2):
    """Pure-JAX f32 reference mirroring the PyTorch forward (eval mode)."""
    wh = h @ W
    fout = W.shape[1]
    e = wh @ a[:fout] + (wh @ a[fout:]).T
    e = jnp.where(e > 0, e, alpha * e)
    att = jnp.where(adj > 0, e, -9.0e15)
    att = jax.nn.softmax(att, axis=1)
    hp = att @ wh
    hp = hp @ fc_w.T + fc_b
    return jnp.where(hp > 0, hp, jnp.expm1(hp))


def _reference_bf16(h, adj, W, a, fc_w, fc_b, alpha=0.2):
    """Reference with the same bf16 casting points as the kernel."""
    fout = W.shape[1]
    w_ext = jnp.concatenate([W, W @ a[:fout], W @ a[fout:]], axis=1)
    whe = jnp.dot(h.astype(jnp.bfloat16), w_ext.astype(jnp.bfloat16),
                  preferred_element_type=jnp.float32)
    wh = whe[:, :fout].astype(jnp.bfloat16)
    e = whe[:, fout:fout + 1] + whe[:, fout + 1:fout + 2].T
    e = jnp.where(e > 0, e, alpha * e)
    att = jnp.where(adj > 0, e, -9.0e15)
    m = jnp.max(att, axis=1, keepdims=True)
    p = jnp.exp(att - m)
    s = jnp.sum(p, axis=1, keepdims=True)
    hp = jnp.dot(p.astype(jnp.bfloat16), wh,
                 preferred_element_type=jnp.float32) / s
    hp = jnp.dot(hp.astype(jnp.bfloat16), fc_w.T.astype(jnp.bfloat16),
                 preferred_element_type=jnp.float32) + fc_b
    return jnp.where(hp > 0, hp, jnp.expm1(hp))


if __name__ == "__main__":
    key = jax.random.PRNGKey(0)
    N, F_IN, F_OUT = 256, 32, 16      # N=256 -> grid of 2 row tiles (TILE_Q=128)
    ALPHA = 0.2

    k_h, k_adj, k_w, k_a, k_fw, k_fb = jax.random.split(key, 6)

    h = jax.random.normal(k_h, (N, F_IN), dtype=jnp.float32)

    # Random sparse-ish adjacency with self loops.
    adj = (jax.random.uniform(k_adj, (N, N)) > 0.7).astype(jnp.float32)
    adj = jnp.maximum(adj, jnp.eye(N, dtype=jnp.float32))

    # Deterministic "xavier-like" parameter init (shapes match the module).
    def xavier(k, shape, gain=1.414):
        bound = gain * (6.0 / (shape[0] + shape[1])) ** 0.5
        return jax.random.uniform(k, shape, jnp.float32, -bound, bound)

    W = xavier(k_w, (F_IN, F_OUT))
    a = xavier(k_a, (2 * F_OUT, 1))
    fc_bound = 1.0 / (F_OUT ** 0.5)
    fc_w = jax.random.uniform(k_fw, (F_IN, F_OUT), jnp.float32,
                              -fc_bound, fc_bound)
    fc_b = jax.random.uniform(k_fb, (F_IN,), jnp.float32,
                              -fc_bound, fc_bound)

    out = graph_attention_layer(h, adj, W, a, fc_w, fc_b, alpha=ALPHA)
    out = jax.block_until_ready(out)
    assert out.shape == (N, F_IN)
    assert bool(jnp.all(jnp.isfinite(out)))

    # Tight check vs a reference with identical bf16 casting points.
    ref_matched = _reference_bf16(h, adj, W, a, fc_w, fc_b, alpha=ALPHA)
    err_matched = float(jnp.max(jnp.abs(out - ref_matched)))
    assert jnp.allclose(out, ref_matched, atol=5e-2, rtol=5e-2), err_matched

    # Looser check vs the pure-f32 PyTorch-equivalent reference.
    ref_f32 = _reference(h, adj, W, a, fc_w, fc_b, alpha=ALPHA)
    err_f32 = float(jnp.max(jnp.abs(out - ref_f32)))
    assert jnp.allclose(out, ref_f32, atol=2e-1, rtol=2e-1), err_f32

    print("KERNEL_OK")
</pallas_src>

<mosaic_0001>
module attributes {stable_mosaic.version = 11 : i64} {
  func.func @_proj_kernel(%arg0: memref<256x32xbf16, #tpu.memory_space<vmem>>, %arg1: memref<32x18xbf16, #tpu.memory_space<vmem>>, %arg2: memref<256x16xbf16, #tpu.memory_space<vmem>>, %arg3: memref<256x2xf32, #tpu.memory_space<vmem>>) attributes {dimension_semantics = [], scalar_prefetch = 0 : i64, scratch_operands = 0 : i64, tpu.core_type = #tpu.core_type<tc>} {
    %c0 = arith.constant 0 : index
    %c0_0 = arith.constant 0 : index
    %0 = vector.load %arg0[%c0, %c0_0] : memref<256x32xbf16, #tpu.memory_space<vmem>>, vector<256x32xbf16>
    %c0_1 = arith.constant 0 : index
    %c0_2 = arith.constant 0 : index
    %1 = vector.load %arg1[%c0_1, %c0_2] : memref<32x18xbf16, #tpu.memory_space<vmem>>, vector<32x18xbf16>
    %cst = arith.constant dense<0.000000e+00> : vector<256x18xf32>
    %2 = tpu.matmul %0, %1, %cst {dimension_numbers = #tpu.dot_dimension_numbers<[1], [0], [0], [1], [0, 0, 1, 1], [], []>} : vector<256x32xbf16>, vector<32x18xbf16>, vector<256x18xf32> -> vector<256x18xf32>
    %3 = vector.extract_strided_slice %2 {offsets = [0, 0], sizes = [256, 16], strides = [1, 1]} : vector<256x18xf32> to vector<256x16xf32>
    %4 = arith.truncf %3 : vector<256x16xf32> to vector<256x16xbf16>
    %c0_3 = arith.constant 0 : index
    %c0_4 = arith.constant 0 : index
    %5 = vector.load %arg2[%c0_3, %c0_4] : memref<256x16xbf16, #tpu.memory_space<vmem>>, vector<256x16xbf16>
    tpu.vector_store %arg2[%c0_3, %c0_4], %4 {strides = array<i32>} : memref<256x16xbf16, #tpu.memory_space<vmem>>, vector<256x16xbf16>,
    %6 = vector.extract_strided_slice %2 {offsets = [0, 16], sizes = [256, 2], strides = [1, 1]} : vector<256x18xf32> to vector<256x2xf32>
    %c0_5 = arith.constant 0 : index
    %c0_6 = arith.constant 0 : index
    %7 = vector.load %arg3[%c0_5, %c0_6] : memref<256x2xf32, #tpu.memory_space<vmem>>, vector<256x2xf32>
    tpu.vector_store %arg3[%c0_5, %c0_6], %6 {strides = array<i32>} : memref<256x2xf32, #tpu.memory_space<vmem>>, vector<256x2xf32>,
    return
  }
}

</mosaic_0001>

<bundles_post_ra>
// kernel: tpu_custom_call.1
= control target key start
LH: loop header
LB: loop body
LE: loop exit
PB: predicated region body
PF: predicated region fallthrough
CT: control target
= control target key end

     0   :  { %vm142_vm0 = vcmask 261120   ;;  %vm312_vm1 = vcmask 125952   ;;  %s627_s20 = smov 112   ;;  %vm473_vm2 = vcmask 15360   ;;  %s1006_s1 = inlined_call_operand.vmem [shape: bf16[32,18], index: 1, kind: input, shape index: {}]   ;;  %s1007_s0 = inlined_call_operand.vmem [shape: bf16[256,32], index: 0, kind: input, shape index: {}]   ;;  %s1008_s2 = inlined_call_operand.vmem [shape: bf16[256,16], index: 2, kind: output, shape index: {0}]   ;;  %s1009_s3 = inlined_call_operand.vmem [shape: f32[256,2], index: 3, kind: output, shape index: {1}]  }
   0x1   :  { %v619_v0 = vld [vmem:[%s1006_s1 + $0x8] sm:$0xff]  ;;  %v618_v1 = vld [vmem:[%s1006_s1] sm:$0xff]  ;;  %v604_v10 = vld [vmem:[%s1007_s0 + $0x10] sm:$0xff] }
   0x2   :  { %197 = vmatpush.bf16.msra.mxu0 %v619_v0  ;;  %621 = vmatpush.bf16.msra.mxu2 %v619_v0  ;;  %v602_v2 = vld [vmem:[%s1007_s0] sm:$0xff]  ;;  %v603_v6 = vld [vmem:[%s1007_s0 + $0x8] sm:$0xff]  ;;  %v612_v11 = vld [vmem:[%s1007_s0 + $0x50] sm:$0xff] }
   0x3   :  { %622 = vmatpush.bf16.msra.mxu3 %v619_v0  ;;  %620 = vmatpush.bf16.msra.mxu1 %v619_v0  ;;  %v610_v3 = vld [vmem:[%s1007_s0 + $0x40] sm:$0xff]  ;;  %v611_v7 = vld [vmem:[%s1007_s0 + $0x48] sm:$0xff]  ;;  %v616_v12 = vld [vmem:[%s1007_s0 + $0x70] sm:$0xff] }
   0x4   :  { %v614_v4 = vld [vmem:[%s1007_s0 + $0x60] sm:$0xff]  ;;  %v615_v8 = vld [vmem:[%s1007_s0 + $0x68] sm:$0xff]  ;;  %v608_v13 = vld [vmem:[%s1007_s0 + $0x30] sm:$0xff] }
   0x5   :  { %v606_v5 = vld [vmem:[%s1007_s0 + $0x20] sm:$0xff]  ;;  %v607_v9 = vld [vmem:[%s1007_s0 + $0x28] sm:$0xff]  ;;  %v613_v14 = vld [vmem:[%s1007_s0 + $0x58] sm:$0xff] }
   0x6   :  { %198 = vmatpush.bf16.msra.mxu0 %v618_v1  ;;  %624 = vmatpush.bf16.msra.mxu2 %v618_v1  ;;  %v605_v15 = vld [vmem:[%s1007_s0 + $0x18] sm:$0xff] }
   0x7   :  { %625 = vmatpush.bf16.msra.mxu3 %v618_v1  ;;  %623 = vmatpush.bf16.msra.mxu1 %v618_v1  ;;  %v609_v16 = vld [vmem:[%s1007_s0 + $0x38] sm:$0xff] }
   0x8   :  { %v617_v17 = vld [vmem:[%s1007_s0 + $0x78] sm:$0xff] }
   0x9   :  { %586 = vmatmul.msk.bf16.vlgmr.msra.gmra.mxu0 %vm142_vm0, %v602_v2  ;;  %594 = vmatmul.msk.bf16.vlgmr.msra.gmra.mxu2 %vm142_vm0, %v610_v3 }
   0xa   :  { %598 = vmatmul.msk.bf16.vlgmr.msra.gmra.mxu3 %vm142_vm0, %v614_v4  ;;  %590 = vmatmul.msk.bf16.vlgmr.msra.gmra.mxu1 %vm142_vm0, %v606_v5 }
  0x19   :  { %587 = vmatmul.msk.bf16.gmra.mxu0 %vm142_vm0, %v603_v6  ;;  %595 = vmatmul.msk.bf16.gmra.mxu2 %vm142_vm0, %v611_v7 }
  0x1a   :  { %599 = vmatmul.msk.bf16.gmra.mxu3 %vm142_vm0, %v615_v8  ;;  %591 = vmatmul.msk.bf16.gmra.mxu1 %vm142_vm0, %v607_v9 }
  0x29   :  { %588 = vmatmul.msk.bf16.gmra.mxu0 %vm142_vm0, %v604_v10  ;;  %596 = vmatmul.msk.bf16.gmra.mxu2 %vm142_vm0, %v612_v11 }
  0x2a   :  { %600 = vmatmul.msk.bf16.gmra.mxu3 %vm142_vm0, %v616_v12  ;;  %592 = vmatmul.msk.bf16.gmra.mxu1 %vm142_vm0, %v608_v13 }
  0x39   :  { %597 = vmatmul.msk.bf16.gmra.mxu2 %vm142_vm0, %v613_v14  ;;  %589 = vmatmul.msk.bf16.gmra.mxu0 %vm142_vm0, %v605_v15 }
  0x3a   :  { %593 = vmatmul.msk.bf16.gmra.mxu1 %vm142_vm0, %v609_v16  ;;  %601 = vmatmul.msk.bf16.gmra.mxu3 %vm142_vm0, %v617_v17 }
  0x86   :  { %v200_v18 = vpop.f32.mrf.mxu0 }
  0x87   :  { %v280_v19 = vpack.c.bf16 %v200_v18, %v200_v18  ;;  %377 = vrot.lane.b32.xlu0 %v200_v18, %s627_s20  ;;  %v220_v20 = vpop.f32.mrf.mxu1 }
  0x88   :  { %v288_v21 = vpack.c.bf16 %v220_v20, %v220_v20  ;;  %393 = vrot.lane.b32.xlu2 %v220_v20, %s627_s20 }
  0x89   :  { %313 = vst.msk [vmem:[%s1008_s2] sm:$0xf] %vm312_vm1, %v280_v19 }
  0x8a   :  { %321 = vst.msk [vmem:[%s1008_s2 + $0x20] sm:$0xf] %vm312_vm1, %v288_v21 }
  0x8c   :  { %v240_v22 = vpop.f32.mrf.mxu2 }
  0x8d   :  { %v296_v23 = vpack.c.bf16 %v240_v22, %v240_v22  ;;  %v260_v24 = vpop.f32.mrf.mxu3  ;;  %409 = vrot.lane.b32.xlu1 %v240_v22, %s627_s20 }
  0x8e   :  { %v304_v25 = vpack.c.bf16 %v260_v24, %v260_v24  ;;  %v202_v26 = vpop.f32.mrf.mxu0 }
  0x8f   :  { %329 = vst.msk [vmem:[%s1008_s2 + $0x40] sm:$0xf] %vm312_vm1, %v296_v23  ;;  %v281_v27 = vpack.c.bf16 %v202_v26, %v202_v26  ;;  %425 = vrot.lane.b32.xlu0 %v260_v24, %s627_s20  ;;  %v222_v28 = vpop.f32.mrf.mxu1 }
  0x90   :  { %337 = vst.msk [vmem:[%s1008_s2 + $0x60] sm:$0xf] %vm312_vm1, %v304_v25  ;;  %v289_v29 = vpack.c.bf16 %v222_v28, %v222_v28 }
  0x91   :  { %314 = vst.msk [vmem:[%s1008_s2 + $0x4] sm:$0xf] %vm312_vm1, %v281_v27 }
  0x92   :  { %322 = vst.msk [vmem:[%s1008_s2 + $0x24] sm:$0xf] %vm312_vm1, %v289_v29 }
  0x94   :  { %v242_v30 = vpop.f32.mrf.mxu2 }
  0x95   :  { %v297_v31 = vpack.c.bf16 %v242_v30, %v242_v30  ;;  %v262_v32 = vpop.f32.mrf.mxu3  ;;  %411 = vrot.lane.b32.xlu2 %v242_v30, %s627_s20 }
  0x96   :  { %v305_v33 = vpack.c.bf16 %v262_v32, %v262_v32  ;;  %427 = vrot.lane.b32.xlu1 %v262_v32, %s627_s20  ;;  %v205_v34 = vpop.f32.mrf.mxu0 }
  0x97   :  { %330 = vst.msk [vmem:[%s1008_s2 + $0x44] sm:$0xf] %vm312_vm1, %v297_v31  ;;  %v282_v35 = vpack.c.bf16 %v205_v34, %v205_v34  ;;  %379 = vrot.lane.b32.xlu0 %v202_v26, %s627_s20  ;;  %v225_v36 = vpop.f32.mrf.mxu1 }
  0x98   :  { %338 = vst.msk [vmem:[%s1008_s2 + $0x64] sm:$0xf] %vm312_vm1, %v305_v33  ;;  %v290_v37 = vpack.c.bf16 %v225_v36, %v225_v36 }
  0x99   :  { %315 = vst.msk [vmem:[%s1008_s2 + $0x8] sm:$0xf] %vm312_vm1, %v282_v35 }
  0x9a   :  { %323 = vst.msk [vmem:[%s1008_s2 + $0x28] sm:$0xf] %vm312_vm1, %v290_v37 }
  0x9c   :  { %v245_v38 = vpop.f32.mrf.mxu2 }
  0x9d   :  { %v265_v39 = vpop.f32.mrf.mxu3  ;;  %v298_v40 = vpack.c.bf16 %v245_v38, %v245_v38 }
  0x9e   :  { %v306_v41 = vpack.c.bf16 %v265_v39, %v265_v39  ;;  %429 = vrot.lane.b32.xlu2 %v265_v39, %s627_s20  ;;  %381 = vrot.lane.b32.xlu1 %v205_v34, %s627_s20  ;;  %v207_v42 = vpop.f32.mrf.mxu0 }
  0x9f   :  { %v283_v43 = vpack.c.bf16 %v207_v42, %v207_v42  ;;  %395 = vrot.lane.b32.xlu0 %v222_v28, %s627_s20  ;;  %v227_v44 = vpop.f32.mrf.mxu1  ;;  %331 = vst.msk [vmem:[%s1008_s2 + $0x48] sm:$0xf] %vm312_vm1, %v298_v40 }
  0xa0   :  { %339 = vst.msk [vmem:[%s1008_s2 + $0x68] sm:$0xf] %vm312_vm1, %v306_v41  ;;  %v291_v45 = vpack.c.bf16 %v227_v44, %v227_v44 }
  0xa1   :  { %316 = vst.msk [vmem:[%s1008_s2 + $0xc] sm:$0xf] %vm312_vm1, %v283_v43 }
  0xa2   :  { %324 = vst.msk [vmem:[%s1008_s2 + $0x2c] sm:$0xf] %vm312_vm1, %v291_v45 }
  0xa4   :  { %v247_v46 = vpop.f32.mrf.mxu2 }
  0xa5   :  { %v299_v47 = vpack.c.bf16 %v247_v46, %v247_v46  ;;  %v267_v48 = vpop.f32.mrf.mxu3 }
  0xa6   :  { %399 = vrot.lane.b32.xlu2 %v227_v44, %s627_s20  ;;  %397 = vrot.lane.b32.xlu1 %v225_v36, %s627_s20  ;;  %v210_v49 = vpop.f32.mrf.mxu0  ;;  %v307_v50 = vpack.c.bf16 %v267_v48, %v267_v48 }
  0xa7   :  { %413 = vrot.lane.b32.xlu0 %v245_v38, %s627_s20  ;;  %v284_v51 = vpack.c.bf16 %v210_v49, %v210_v49  ;;  %332 = vst.msk [vmem:[%s1008_s2 + $0x4c] sm:$0xf] %vm312_vm1, %v299_v47  ;;  %v230_v52 = vpop.f32.mrf.mxu1 }
  0xa8   :  { %340 = vst.msk [vmem:[%s1008_s2 + $0x6c] sm:$0xf] %vm312_vm1, %v307_v50  ;;  %v292_v53 = vpack.c.bf16 %v230_v52, %v230_v52 }
  0xa9   :  { %317 = vst.msk [vmem:[%s1008_s2 + $0x10] sm:$0xf] %vm312_vm1, %v284_v51 }
  0xaa   :  { %325 = vst.msk [vmem:[%s1008_s2 + $0x30] sm:$0xf] %vm312_vm1, %v292_v53 }
  0xac   :  { %v250_v54 = vpop.f32.mrf.mxu2 }
  0xad   :  { %v300_v55 = vpack.c.bf16 %v250_v54, %v250_v54  ;;  %v270_v56 = vpop.f32.mrf.mxu3 }
  0xae   :  { %383 = vrot.lane.b32.xlu1 %v207_v42, %s627_s20  ;;  %385 = vrot.lane.b32.xlu2 %v210_v49, %s627_s20  ;;  %v308_v57 = vpack.c.bf16 %v270_v56, %v270_v56  ;;  %v212_v58 = vpop.f32.mrf.mxu0 }
  0xaf   :  { %431 = vrot.lane.b32.xlu0 %v267_v48, %s627_s20  ;;  %333 = vst.msk [vmem:[%s1008_s2 + $0x50] sm:$0xf] %vm312_vm1, %v300_v55  ;;  %v285_v59 = vpack.c.bf16 %v212_v58, %v212_v58  ;;  %v232_v60 = vpop.f32.mrf.mxu1 }
  0xb0   :  { %341 = vst.msk [vmem:[%s1008_s2 + $0x70] sm:$0xf] %vm312_vm1, %v308_v57  ;;  %v293_v61 = vpack.c.bf16 %v232_v60, %v232_v60 }
  0xb1   :  { %318 = vst.msk [vmem:[%s1008_s2 + $0x14] sm:$0xf] %vm312_vm1, %v285_v59 }
  0xb2   :  { %326 = vst.msk [vmem:[%s1008_s2 + $0x34] sm:$0xf] %vm312_vm1, %v293_v61 }
  0xb4   :  { %v252_v62 = vpop.f32.mrf.mxu2 }
  0xb5   :  { %v301_v63 = vpack.c.bf16 %v252_v62, %v252_v62  ;;  %v272_v0 = vpop.f32.mrf.mxu3 }
  0xb6   :  { %415 = vrot.lane.b32.xlu1 %v247_v46, %s627_s20  ;;  %417 = vrot.lane.b32.xlu2 %v250_v54, %s627_s20  ;;  %v309_v1 = vpack.c.bf16 %v272_v0, %v272_v0  ;;  %v215_v2 = vpop.f32.mrf.mxu0 }
  0xb7   :  { %401 = vrot.lane.b32.xlu0 %v230_v52, %s627_s20  ;;  %334 = vst.msk [vmem:[%s1008_s2 + $0x54] sm:$0xf] %vm312_vm1, %v301_v63  ;;  %v286_v3 = vpack.c.bf16 %v215_v2, %v215_v2  ;;  %v235_v4 = vpop.f32.mrf.mxu1 }
  0xb8   :  { %342 = vst.msk [vmem:[%s1008_s2 + $0x74] sm:$0xf] %vm312_vm1, %v309_v1  ;;  %v294_v5 = vpack.c.bf16 %v235_v4, %v235_v4 }
  0xb9   :  { %319 = vst.msk [vmem:[%s1008_s2 + $0x18] sm:$0xf] %vm312_vm1, %v286_v3 }
  0xba   :  { %327 = vst.msk [vmem:[%s1008_s2 + $0x38] sm:$0xf] %vm312_vm1, %v294_v5 }
  0xbc   :  { %v255_v6 = vpop.f32.mrf.mxu2 }
  0xbd   :  { %v302_v7 = vpack.c.bf16 %v255_v6, %v255_v6  ;;  %v275_v8 = vpop.f32.mrf.mxu3 }
  0xbe   :  { %433 = vrot.lane.b32.xlu1 %v270_v56, %s627_s20  ;;  %387 = vrot.lane.b32.xlu2 %v212_v58, %s627_s20  ;;  %v217_v9 = vpop.f32.mrf.mxu0  ;;  %v310_v10 = vpack.c.bf16 %v275_v8, %v275_v8 }
  0xbf   :  { %419 = vrot.lane.b32.xlu0 %v252_v62, %s627_s20  ;;  %335 = vst.msk [vmem:[%s1008_s2 + $0x58] sm:$0xf] %vm312_vm1, %v302_v7  ;;  %v287_v11 = vpack.c.bf16 %v217_v9, %v217_v9  ;;  %v237_v12 = vpop.f32.mrf.mxu1 }
  0xc0   :  { %v295_v13 = vpack.c.bf16 %v237_v12, %v237_v12  ;;  %343 = vst.msk [vmem:[%s1008_s2 + $0x78] sm:$0xf] %vm312_vm1, %v310_v10 }
  0xc1   :  { %320 = vst.msk [vmem:[%s1008_s2 + $0x1c] sm:$0xf] %vm312_vm1, %v287_v11 }
  0xc2   :  { %328 = vst.msk [vmem:[%s1008_s2 + $0x3c] sm:$0xf] %vm312_vm1, %v295_v13 }
  0xc4   :  { %v257_v14 = vpop.f32.mrf.mxu2 }
  0xc5   :  { %v303_v15 = vpack.c.bf16 %v257_v14, %v257_v14  ;;  %v277_v16 = vpop.f32.mrf.mxu3 }
  0xc6   :  { %403 = vrot.lane.b32.xlu1 %v232_v60, %s627_s20  ;;  %405 = vrot.lane.b32.xlu2 %v235_v4, %s627_s20  ;;  %v311_v17 = vpack.c.bf16 %v277_v16, %v277_v16 }
  0xc7   :  { %389 = vrot.lane.b32.xlu0 %v215_v2, %s627_s20  ;;  %336 = vst.msk [vmem:[%s1008_s2 + $0x5c] sm:$0xf] %vm312_vm1, %v303_v15 }
  0xc8   :  { %344 = vst.msk [vmem:[%s1008_s2 + $0x7c] sm:$0xf] %vm312_vm1, %v311_v17 }
  0xce   :  { %421 = vrot.lane.b32.xlu1 %v255_v6, %s627_s20  ;;  %423 = vrot.lane.b32.xlu2 %v257_v14, %s627_s20 }
  0xcf   :  { %407 = vrot.lane.b32.xlu0 %v237_v12, %s627_s20 }
  0xd6   :  { %435 = vrot.lane.b32.xlu2 %v272_v0, %s627_s20  ;;  %391 = vrot.lane.b32.xlu1 %v217_v9, %s627_s20 }
  0xd7   :  { %437 = vrot.lane.b32.xlu0 %v275_v8, %s627_s20 }
  0xde   :  { %439 = vrot.lane.b32.xlu1 %v277_v16, %s627_s20 }
  0xe2   :  { %v394_v18 = vpop.permute.xlu2 %393 }
  0xe3   :  { %482 = vst.msk [vmem:[%s1009_s3 + $0x40] sm:$0xff] %vm473_vm2, %v394_v18 }
  0xef   :  { %v412_v19 = vpop.permute.xlu2 %411 }
  0xf0   :  { %491 = vst.msk [vmem:[%s1009_s3 + $0x88] sm:$0xff] %vm473_vm2, %v412_v19 }
  0xf8   :  { %v430_v20 = vpop.permute.xlu2 %429 }
  0xf9   :  { %500 = vst.msk [vmem:[%s1009_s3 + $0xd0] sm:$0xff] %vm473_vm2, %v430_v20  ;;  %v378_v21 = vpop.permute.xlu0 %377 }
  0xfa   :  { %474 = vst.msk [vmem:[%s1009_s3] sm:$0xff] %vm473_vm2, %v378_v21 }
  0xff   :  { %v410_v22 = vpop.permute.xlu1 %409 }
 0x100   :  { %490 = vst.msk [vmem:[%s1009_s3 + $0x80] sm:$0xff] %vm473_vm2, %v410_v22  ;;  %v400_v23 = vpop.permute.xlu2 %399 }
 0x101   :  { %485 = vst.msk [vmem:[%s1009_s3 + $0x58] sm:$0xff] %vm473_vm2, %v400_v23  ;;  %v426_v24 = vpop.permute.xlu0 %425 }
 0x102   :  { %498 = vst.msk [vmem:[%s1009_s3 + $0xc0] sm:$0xff] %vm473_vm2, %v426_v24 }
 0x108   :  { %v428_v25 = vpop.permute.xlu1 %427  ;;  %v386_v26 = vpop.permute.xlu2 %385 }
 0x109   :  { %499 = vst.msk [vmem:[%s1009_s3 + $0xc8] sm:$0xff] %vm473_vm2, %v428_v25  ;;  %v380_v27 = vpop.permute.xlu0 %379 }
 0x10a   :  { %478 = vst.msk [vmem:[%s1009_s3 + $0x20] sm:$0xff] %vm473_vm2, %v386_v26 }
 0x10b   :  { %475 = vst.msk [vmem:[%s1009_s3 + $0x8] sm:$0xff] %vm473_vm2, %v380_v27 }
 0x110   :  { %v382_v28 = vpop.permute.xlu1 %381  ;;  %v418_v29 = vpop.permute.xlu2 %417 }
 0x111   :  { %476 = vst.msk [vmem:[%s1009_s3 + $0x10] sm:$0xff] %vm473_vm2, %v382_v28  ;;  %v396_v30 = vpop.permute.xlu0 %395 }
 0x112   :  { %494 = vst.msk [vmem:[%s1009_s3 + $0xa0] sm:$0xff] %vm473_vm2, %v418_v29 }
 0x113   :  { %483 = vst.msk [vmem:[%s1009_s3 + $0x48] sm:$0xff] %vm473_vm2, %v396_v30 }
 0x118   :  { %v398_v31 = vpop.permute.xlu1 %397  ;;  %v388_v32 = vpop.permute.xlu2 %387 }
 0x119   :  { %484 = vst.msk [vmem:[%s1009_s3 + $0x50] sm:$0xff] %vm473_vm2, %v398_v31  ;;  %v414_v33 = vpop.permute.xlu0 %413 }
 0x11a   :  { %479 = vst.msk [vmem:[%s1009_s3 + $0x28] sm:$0xff] %vm473_vm2, %v388_v32 }
 0x11b   :  { %492 = vst.msk [vmem:[%s1009_s3 + $0x90] sm:$0xff] %vm473_vm2, %v414_v33 }
 0x120   :  { %v384_v34 = vpop.permute.xlu1 %383  ;;  %v406_v35 = vpop.permute.xlu2 %405 }
 0x121   :  { %477 = vst.msk [vmem:[%s1009_s3 + $0x18] sm:$0xff] %vm473_vm2, %v384_v34  ;;  %v432_v36 = vpop.permute.xlu0 %431 }
 0x122   :  { %488 = vst.msk [vmem:[%s1009_s3 + $0x70] sm:$0xff] %vm473_vm2, %v406_v35 }
 0x123   :  { %501 = vst.msk [vmem:[%s1009_s3 + $0xd8] sm:$0xff] %vm473_vm2, %v432_v36 }
 0x128   :  { %v416_v37 = vpop.permute.xlu1 %415  ;;  %v424_v38 = vpop.permute.xlu2 %423 }
 0x129   :  { %493 = vst.msk [vmem:[%s1009_s3 + $0x98] sm:$0xff] %vm473_vm2, %v416_v37  ;;  %v402_v39 = vpop.permute.xlu0 %401 }
 0x12a   :  { %497 = vst.msk [vmem:[%s1009_s3 + $0xb8] sm:$0xff] %vm473_vm2, %v424_v38 }
 0x12b   :  { %486 = vst.msk [vmem:[%s1009_s3 + $0x60] sm:$0xff] %vm473_vm2, %v402_v39 }
 0x130   :  { %v434_v40 = vpop.permute.xlu1 %433  ;;  %v436_v41 = vpop.permute.xlu2 %435 }
 0x131   :  { %502 = vst.msk [vmem:[%s1009_s3 + $0xe0] sm:$0xff] %vm473_vm2, %v434_v40  ;;  %v420_v42 = vpop.permute.xlu0 %419 }
 0x132   :  { %503 = vst.msk [vmem:[%s1009_s3 + $0xe8] sm:$0xff] %vm473_vm2, %v436_v41 }
 0x133   :  { %495 = vst.msk [vmem:[%s1009_s3 + $0xa8] sm:$0xff] %vm473_vm2, %v420_v42 }
 0x138   :  { %v404_v43 = vpop.permute.xlu1 %403 }
 0x139   :  { %487 = vst.msk [vmem:[%s1009_s3 + $0x68] sm:$0xff] %vm473_vm2, %v404_v43  ;;  %v390_v44 = vpop.permute.xlu0 %389 }
 0x13a   :  { %480 = vst.msk [vmem:[%s1009_s3 + $0x30] sm:$0xff] %vm473_vm2, %v390_v44 }
 0x140   :  { %v422_v45 = vpop.permute.xlu1 %421 }
 0x141   :  { %496 = vst.msk [vmem:[%s1009_s3 + $0xb0] sm:$0xff] %vm473_vm2, %v422_v45  ;;  %v408_v46 = vpop.permute.xlu0 %407 }
 0x142   :  { %489 = vst.msk [vmem:[%s1009_s3 + $0x78] sm:$0xff] %vm473_vm2, %v408_v46 }
 0x148   :  { %v392_v47 = vpop.permute.xlu1 %391 }
 0x149   :  { %481 = vst.msk [vmem:[%s1009_s3 + $0x38] sm:$0xff] %vm473_vm2, %v392_v47  ;;  %v438_v48 = vpop.permute.xlu0 %437 }
 0x14a   :  { %504 = vst.msk [vmem:[%s1009_s3 + $0xf0] sm:$0xff] %vm473_vm2, %v438_v48 }
 0x150   :  { %v440_v49 = vpop.permute.xlu1 %439 }
 0x151   :  { %505 = vst.msk [vmem:[%s1009_s3 + $0xf8] sm:$0xff] %vm473_vm2, %v440_v49 }

</bundles_post_ra>
